<compile_context>
chip_gen: v7x
topology: tpu7x:2x2x1
jax: 0.10.0
libtpu: 0.0.40
codegen_flags: <defaults>
</compile_context>

<pallas_src>
import functools

import jax
import jax.numpy as jnp
from jax.experimental import pallas as pl
from jax.experimental.pallas import tpu as pltpu


def _maxpool_k2_kernel(x_ref, o_ref, *, H, W):
    """2x2 / stride-1 max pool with fused replicate pad on (cb, g*H*W) blocks.

    Each sublane row holds `g` whole (H, W) planes flattened row-major.
    out[h, w] = max over {h, min(h+1,H-1)} x {w, min(w+1,W-1)} of x, computed
    separably: a +1 lane shift for the horizontal pass and a +W lane shift for
    the vertical pass, each followed by a per-plane replicate fix-up mask, so
    neighbouring planes in the same packed row never mix.
    """
    x = x_ref[...]                                   # (cb, L), L = g*H*W
    L = x.shape[-1]
    HW = H * W

    # One small (1, L) iota drives both masks; sublane broadcast is cheap.
    lane = jax.lax.broadcasted_iota(jnp.int32, (1, L), 1)

    def shift_left(v, s):
        # u[:, i] = v[:, (i + s) % L]; wrapped lanes are fixed up by the masks.
        return jnp.concatenate([v[:, s:], v[:, :s]], axis=-1)

    out = x
    # Horizontal pass: max(x[h, w], x[h, min(w+1, W-1)])
    if W > 1:
        nxt = shift_left(out, 1)
        last_col = (lane % W) == (W - 1)             # replicate pad on the right
        out = jnp.maximum(out, jnp.where(last_col, out, nxt))
    # Vertical pass: max(rowmax[h, w], rowmax[min(h+1, H-1), w])
    if H > 1:
        dwn = shift_left(out, W)
        last_row = (lane % HW) >= (H - 1) * W        # replicate pad at the bottom
        out = jnp.maximum(out, jnp.where(last_row, out, dwn))

    o_ref[...] = out


def _maxpool_stride1_ref(x, kernel_size):
    """Pure-JAX reference of the PyTorch forward (also the k > 2 fallback)."""
    k = int(kernel_size)
    pad = k - 1
    s = pad
    xp = jnp.pad(x, ((0, 0), (0, 0), (0, pad), (0, pad)), mode="edge")
    Hp, Wp = xp.shape[2], xp.shape[3]
    Ho = (Hp - k) // s + 1
    Wo = (Wp - k) // s + 1
    out = None
    for ki in range(k):
        for kj in range(k):
            win = xp[:, :, ki:ki + (Ho - 1) * s + 1:s, kj:kj + (Wo - 1) * s + 1:s]
            out = win if out is None else jnp.maximum(out, win)
    return out


def _lane_utilization(lanes):
    return lanes / float(((lanes + 127) // 128) * 128)


def _choose_pack_factor(NC, HW, sublane):
    """Pick g (planes packed per sublane row).

    g must divide NC, keep the row width modest (<= 8192 lanes) and leave at
    least two sublane tiles of rows (otherwise we'd trade lane padding for far
    worse sublane padding).  Among valid g we take a small one whose lane
    utilization is within ~2% of the best.
    """
    best_g, best_u = 1, _lane_utilization(HW)
    for g in range(2, 65):
        if NC % g or g * HW > 8192 or NC // g < 2 * sublane:
            continue
        u = _lane_utilization(g * HW)
        if u > best_u + 0.02:
            best_g, best_u = g, u
    return best_g


def max_pool_stride1(x, kernel_size):
    """x: (N, C, H, W).  Matches MaxPoolStride1(kernel_size).forward(x)."""
    k = int(kernel_size)
    assert k >= 2, "MaxPoolStride1 requires kernel_size >= 2 (stride = k - 1)"
    if k != 2:
        # TODO(synk): kernel_size > 2 (stride > 1) keeps the plain-JAX fallback;
        # darknet only ever instantiates this module with kernel_size == 2.
        return _maxpool_stride1_ref(x, k)

    N, C, H, W = x.shape
    NC, HW = N * C, H * W
    itemsize = jnp.dtype(x.dtype).itemsize
    # dtype-native sublane tile: f32 -> 8, bf16/f16 -> 16, int8/fp8 -> 32.
    sublane = {4: 8, 2: 16, 1: 32}.get(itemsize, 8)

    # Pack g planes per sublane row (free row-major reshape) for lane density.
    g = _choose_pack_factor(NC, HW, sublane)
    rows, L = NC // g, g * HW
    xf = x.reshape(rows, L)

    # Rows per grid step: target ~1 MiB of input per step, but keep ~8 grid
    # steps when the shape allows it (pipelining + 2-TC sharding on v7x),
    # rounded to the dtype-native sublane tile.  Partial final blocks are fine:
    # rows are independent and out-of-bounds rows are never written back.
    row_bytes = L * itemsize
    cb = min(rows, max(1, (1 << 20) // row_bytes))
    if rows > sublane:
        cb = min(cb, max(sublane, pl.cdiv(rows, 8)))
        cb = max(sublane, (cb // sublane) * sublane)
        cb = min(cb, rows)
    grid = (pl.cdiv(rows, cb),)
    block_bytes = cb * L * itemsize
    vmem_limit = int(min(48 << 20, max(32 << 20, 8 * block_bytes)))

    kernel = functools.partial(_maxpool_k2_kernel, H=H, W=W)

    out = pl.pallas_call(
        kernel,
        out_shape=jax.ShapeDtypeStruct((rows, L), x.dtype),
        grid_spec=pltpu.PrefetchScalarGridSpec(
            num_scalar_prefetch=0,
            grid=grid,
            in_specs=[pl.BlockSpec((cb, L), lambda i: (i, 0))],
            out_specs=pl.BlockSpec((cb, L), lambda i: (i, 0)),
        ),
        compiler_params=pltpu.CompilerParams(
            dimension_semantics=("parallel",),   # independent row blocks; 2 TCs on v7x
            vmem_limit_bytes=vmem_limit,
        ),
    )(xf)
    return out.reshape(N, C, H, W)


if __name__ == "__main__":
    key = jax.random.PRNGKey(0)
    k1, k2, k3 = jax.random.split(key, 3)

    # 1) Small NCHW input, kernel_size = 2 (the darknet use case), f32,
    #    128-aligned plane (16x16 -> 256 lanes), single grid step.
    x1 = jax.random.normal(k1, (2, 4, 16, 16), dtype=jnp.float32)
    out1 = jax.block_until_ready(max_pool_stride1(x1, 2))
    ref1 = _maxpool_stride1_ref(x1, 2)
    assert out1.shape == ref1.shape, (out1.shape, ref1.shape)
    assert jnp.array_equal(out1, ref1), "mismatch vs reference (f32, 16x16)"

    # 2) Non-128-multiple plane (13x13, like YOLO) in bf16: exercises the
    #    replicate fix-up masks, the bf16 sublane tile (16) and a 2-step grid.
    x2 = jax.random.normal(k2, (1, 32, 13, 13), dtype=jnp.bfloat16)
    out2 = jax.block_until_ready(max_pool_stride1(x2, 2))
    ref2 = _maxpool_stride1_ref(x2, 2)
    assert out2.shape == ref2.shape, (out2.shape, ref2.shape)
    assert jnp.array_equal(out2, ref2), "mismatch vs reference (bf16, 13x13)"

    # 3) f32 13x13 with enough channels to trigger plane packing (g > 1),
    #    per-plane masks, a multi-step grid and a partial final block.
    x3 = jax.random.normal(k3, (1, 40, 13, 13), dtype=jnp.float32)
    out3 = jax.block_until_ready(max_pool_stride1(x3, 2))
    ref3 = _maxpool_stride1_ref(x3, 2)
    assert out3.shape == ref3.shape, (out3.shape, ref3.shape)
    assert jnp.array_equal(out3, ref3), "mismatch vs reference (f32 packed, 13x13)"

    print("KERNEL_OK")
</pallas_src>

<mosaic_0001>
module attributes {stable_mosaic.version = 11 : i64} {
  func.func @_maxpool_k2_kernel(%arg0: i32, %arg1: memref<8x256xf32, #tpu.memory_space<vmem>>, %arg2: memref<8x256xf32, #tpu.memory_space<vmem>>) attributes {dimension_semantics = [#tpu.dimension_semantics<parallel>], iteration_bounds = array<i64: 1>, scalar_prefetch = 0 : i64, scratch_operands = 0 : i64, tpu.core_type = #tpu.core_type<tc>, window_params = [{transform_indices = @transform_0, window_bounds = array<i64: 8, 256>}, {transform_indices = @transform_1, window_bounds = array<i64: 8, 256>}]} {
    %c0 = arith.constant 0 : index
    %c0_0 = arith.constant 0 : index
    %0 = vector.load %arg1[%c0, %c0_0] : memref<8x256xf32, #tpu.memory_space<vmem>>, vector<8x256xf32>
    %1 = tpu.iota {dimensions = array<i32: 1>} : vector<1x256xi32>
    %2 = vector.extract_strided_slice %0 {offsets = [0, 1], sizes = [8, 255], strides = [1, 1]} : vector<8x256xf32> to vector<8x255xf32>
    %3 = vector.extract_strided_slice %0 {offsets = [0, 0], sizes = [8, 1], strides = [1, 1]} : vector<8x256xf32> to vector<8x1xf32>
    %4 = tpu.concatenate %2, %3 in 1 : vector<8x255xf32>, vector<8x1xf32> -> vector<8x256xf32>
    %c16_i32 = arith.constant 16 : i32
    %c0_i32 = arith.constant 0 : i32
    %5 = arith.cmpi eq, %c16_i32, %c0_i32 : i32
    %c1_i32 = arith.constant 1 : i32
    %6 = arith.select %5, %c1_i32, %c16_i32 : i32
    %7 = vector.broadcast %6 : i32 to vector<1x256xi32>
    %8 = arith.remsi %1, %7 : vector<1x256xi32>
    %c0_i32_1 = arith.constant 0 : i32
    %9 = vector.broadcast %c0_i32_1 : i32 to vector<1x256xi32>
    %10 = arith.cmpi ne, %8, %9 : vector<1x256xi32>
    %c0_i32_2 = arith.constant 0 : i32
    %11 = vector.broadcast %c0_i32_2 : i32 to vector<1x256xi32>
    %12 = arith.cmpi slt, %8, %11 : vector<1x256xi32>
    %c0_i32_3 = arith.constant 0 : i32
    %13 = arith.cmpi slt, %6, %c0_i32_3 : i32
    %14 = vector.broadcast %13 : i1 to vector<1x256xi1>
    %15 = vector.broadcast %14 : vector<1x256xi1> to vector<1x256xi1>
    %16 = arith.xori %12, %15 : vector<1x256xi1>
    %17 = arith.andi %16, %10 : vector<1x256xi1>
    %18 = vector.broadcast %6 : i32 to vector<1x256xi32>
    %19 = arith.addi %8, %18 : vector<1x256xi32>
    %20 = arith.select %17, %19, %8 : vector<1x256xi1>, vector<1x256xi32>
    %c15_i32 = arith.constant 15 : i32
    %21 = vector.broadcast %c15_i32 : i32 to vector<1x256xi32>
    %22 = arith.cmpi eq, %20, %21 : vector<1x256xi32>
    %23 = vector.shape_cast %22 : vector<1x256xi1> to vector<1x256xi1>
    %24 = vector.broadcast %23 : vector<1x256xi1> to vector<8x256xi1>
    %25 = arith.select %24, %0, %4 : vector<8x256xi1>, vector<8x256xf32>
    %26 = arith.maximumf %0, %25 : vector<8x256xf32>
    %27 = vector.extract_strided_slice %26 {offsets = [0, 16], sizes = [8, 240], strides = [1, 1]} : vector<8x256xf32> to vector<8x240xf32>
    %28 = vector.extract_strided_slice %26 {offsets = [0, 0], sizes = [8, 16], strides = [1, 1]} : vector<8x256xf32> to vector<8x16xf32>
    %29 = tpu.concatenate %27, %28 in 1 : vector<8x240xf32>, vector<8x16xf32> -> vector<8x256xf32>
    %c256_i32 = arith.constant 256 : i32
    %c0_i32_4 = arith.constant 0 : i32
    %30 = arith.cmpi eq, %c256_i32, %c0_i32_4 : i32
    %c1_i32_5 = arith.constant 1 : i32
    %31 = arith.select %30, %c1_i32_5, %c256_i32 : i32
    %32 = vector.broadcast %31 : i32 to vector<1x256xi32>
    %33 = arith.remsi %1, %32 : vector<1x256xi32>
    %c0_i32_6 = arith.constant 0 : i32
    %34 = vector.broadcast %c0_i32_6 : i32 to vector<1x256xi32>
    %35 = arith.cmpi ne, %33, %34 : vector<1x256xi32>
    %c0_i32_7 = arith.constant 0 : i32
    %36 = vector.broadcast %c0_i32_7 : i32 to vector<1x256xi32>
    %37 = arith.cmpi slt, %33, %36 : vector<1x256xi32>
    %c0_i32_8 = arith.constant 0 : i32
    %38 = arith.cmpi slt, %31, %c0_i32_8 : i32
    %39 = vector.broadcast %38 : i1 to vector<1x256xi1>
    %40 = vector.broadcast %39 : vector<1x256xi1> to vector<1x256xi1>
    %41 = arith.xori %37, %40 : vector<1x256xi1>
    %42 = arith.andi %41, %35 : vector<1x256xi1>
    %43 = vector.broadcast %31 : i32 to vector<1x256xi32>
    %44 = arith.addi %33, %43 : vector<1x256xi32>
    %45 = arith.select %42, %44, %33 : vector<1x256xi1>, vector<1x256xi32>
    %c240_i32 = arith.constant 240 : i32
    %46 = vector.broadcast %c240_i32 : i32 to vector<1x256xi32>
    %47 = arith.cmpi sge, %45, %46 : vector<1x256xi32>
    %48 = vector.shape_cast %47 : vector<1x256xi1> to vector<1x256xi1>
    %49 = vector.broadcast %48 : vector<1x256xi1> to vector<8x256xi1>
    %50 = arith.select %49, %26, %29 : vector<8x256xi1>, vector<8x256xf32>
    %51 = arith.maximumf %26, %50 : vector<8x256xf32>
    %c0_9 = arith.constant 0 : index
    %c0_10 = arith.constant 0 : index
    %52 = vector.load %arg2[%c0_9, %c0_10] : memref<8x256xf32, #tpu.memory_space<vmem>>, vector<8x256xf32>
    tpu.vector_store %arg2[%c0_9, %c0_10], %51 {strides = array<i32>} : memref<8x256xf32, #tpu.memory_space<vmem>>, vector<8x256xf32>,
    return
  }
  func.func @transform_0(%arg0: i32) -> (i32, i32) {
    %c0_i32 = arith.constant 0 : i32
    %c0_i32_0 = arith.constant 0 : i32
    return %arg0, %c0_i32 : i32, i32
  }
  func.func @transform_1(%arg0: i32) -> (i32, i32) {
    %c0_i32 = arith.constant 0 : i32
    %c0_i32_0 = arith.constant 0 : i32
    return %arg0, %c0_i32 : i32, i32
  }
}

</mosaic_0001>

<bundles_post_ra>
// kernel: tpu_custom_call.1
= control target key start
LH: loop header
LB: loop body
LE: loop exit
PB: predicated region body
PF: predicated region fallthrough
CT: control target
= control target key end

     0   :  { %6 = vsyncpa [#allocation3], 0  ;;  %s225_s0 = inlined_call_operand.hbm [shape: f32[8,256], index: 0, kind: input, shape index: {}]   ;;  %s226_s1 = inlined_call_operand.hbm [shape: f32[8,256], index: 1, kind: output, shape index: {}]  }
   0x1   :  { %7 = vsyncpa [#allocation4], 0  ;;  %s187_s6 = smov [#allocation2]   ;;  %s139_s10 = scalar_lea.hbm %s225_s0, 256 }
   0x2   :  { %s14_s7 = sshll.u32 %s187_s6, 4  ;;  %p140_p0 = scmp.ne.s32.totalorder %s225_s0, %s139_s10  ;;  %s15_s7 = int_to_ptr.vmem [resolvable:$true] %s14_s7 }
   0x3   :  { %p143_p1 = scmp.lt.u32.totalorder %s139_s10, %s225_s0 }
   0x5   :  { %p145_p2 = pnand %p143_p1, %p140_p0 }
   0x7   :  { %148 = shalt.err (!%p145_p2)
}
   0x8   :  { %s149_s15 = scalar_lea.vmem %s15_s7, 256  ;;  %p154_p4 = scmp.lt.s32.totalorder %s15_s7, %s15_s7 }
   0x9   :  { %p150_p3 = scmp.ne.s32.totalorder %s15_s7, %s149_s15  ;;  %p155_p5 = scmp.lt.s32.totalorder %s149_s15, %s149_s15 }
   0xb   :  { %p156_p6 = por %p155_p5, %p154_p4 }
   0xd   :  { %p157_p7 = pnand %p156_p6, %p150_p3 }
   0xf   :  { %160 = shalt.err (!%p157_p7)
}
  0x10   :  { %17 = dma.hbm_to_vmem [thread:$0]  %s225_s0, 256, %s15_s7, [#allocation3]  }
  0x11   :  { %183 = dma.done.wait [#allocation3], 256  }
  0x12   :  { %184 = vsyncadd [#allocation3], 4294967040  ;;  %v21_v0 = vld [vmem:[#allocation2] sm:$0xff]  ;;  %s188_s18 = smov 127   ;;  %v22_v1 = vld [vmem:[#allocation2 + $0x8] sm:$0xff]  ;;  %v23_v2 = vlaneseq  ;;  %vm32_vm0 = vcmask 1039360  }
  0x13   :  { %28 = vrot.lane.b32.xlu0 %v21_v0, %s188_s18  ;;  %s189_s0 = smov 112   ;;  %vm78_vm3 = vcmask 916480   ;;  %s190_s19 = smov [#allocation5]  }
  0x14   :  { %v24_v3 = vand.u32 127, %v23_v2  ;;  %s126_s20 = sshll.u32 %s190_s19, 4  ;;  %s127_s20 = int_to_ptr.vmem [resolvable:$true] %s126_s20 }
  0x15   :  { %s161_s21 = scalar_lea.vmem %s127_s20, 256  ;;  %p166_p9 = scmp.lt.s32.totalorder %s127_s20, %s127_s20 }
  0x16   :  { %v25_v4 = vadd.s32 128, %v24_v3  ;;  %v42_v5 = vand.u32 15, %v24_v3  ;;  %p162_p8 = scmp.ne.s32.totalorder %s127_s20, %s161_s21  ;;  %p167_p10 = scmp.lt.s32.totalorder %s161_s21, %s161_s21 }
  0x17   :  { %30 = vrot.lane.b32.xlu0 %v22_v1, %s188_s18 }
  0x18   :  { %v49_v7 = vand.u32 15, %v25_v4  ;;  %vm62_vm1 = vcmp.eq.s32.totalorder %v42_v5, 15  ;;  %v95_v15 = vand.u32 255, %v25_v4  ;;  %p168_p11 = por %p167_p10, %p166_p9 }
  0x1a   :  { %vm63_vm2 = vcmp.eq.s32.totalorder %v49_v7, 15  ;;  %vm109_vm4 = vcmp.ge.s32.totalorder %v95_v15, 240  ;;  %p169_p12 = pnand %p168_p11, %p162_p8 }
  0x85   :  { %v29_v6 = vpop.permute.xlu0 %28 }
  0x89   :  { %v31_v8 = vpop.permute.xlu0 %30 }
  0x8a   :  { %v33_v9 = vsel %vm32_vm0, %v29_v6, %v31_v8  ;;  %v37_v10 = vsel %vm32_vm0, %v31_v8, %v29_v6 }
  0x8b   :  { %v68_v11 = vsel %vm62_vm1, %v21_v0, %v33_v9  ;;  %v69_v13 = vsel %vm63_vm2, %v22_v1, %v37_v10 }
  0x8c   :  { %v70_v12 = vmax.f32 %v21_v0, %v68_v11  ;;  %v71_v14 = vmax.f32 %v22_v1, %v69_v13 }
  0x8e   :  { %74 = vrot.lane.b32.xlu1 %v70_v12, %s189_s0 }
  0x92   :  { %76 = vrot.lane.b32.xlu1 %v71_v14, %s189_s0 }
 0x100   :  { %v75_v16 = vpop.permute.xlu1 %74 }
 0x104   :  { %v77_v17 = vpop.permute.xlu1 %76 }
 0x105   :  { %v79_v18 = vsel %vm78_vm3, %v75_v16, %v77_v17  ;;  %v83_v19 = vsel %vm78_vm3, %v77_v17, %v75_v16 }
 0x106   :  { %v115_v20 = vsel %vm109_vm4, %v71_v14, %v83_v19  ;;  %v116_v21 = vmax.f32 %v70_v12, %v79_v18 }
 0x107   :  { %v117_v22 = vmax.f32 %v71_v14, %v115_v20 }
 0x108   :  { %118 = vst [vmem:[#allocation5] sm:$0xff] %v116_v21 }
 0x109   :  { %119 = vst [vmem:[#allocation5 + $0x8] sm:$0xff] %v117_v22 }
 0x10a   :  { %172 = shalt.err (!%p169_p12)
}
 0x10b   :  { %s173_s24 = scalar_lea.hbm %s226_s1, 256 }
 0x10c   :  { %p174_p13 = scmp.ne.s32.totalorder %s226_s1, %s173_s24  ;;  %p177_p0 = scmp.lt.u32.totalorder %s173_s24, %s226_s1 }
 0x10e   :  { %p179_p1 = pnand %p177_p0, %p174_p13 }
 0x110   :  { %182 = shalt.err (!%p179_p1)
}
 0x111   :  { %129 = dma.vmem_to_hbm [thread:$0]  %s127_s20, 256, %s226_s1, [#allocation4]  }
 0x112   :  { %185 = dma.done.wait [#allocation4], 256  }
 0x113   :  { %186 = vsyncadd [#allocation4], 4294967040 }
 0x114   :  { %133 = vsyncpa [#allocation3], 1 }
 0x115   :  { %134 = vsyncpa [#allocation4], 1 }

</bundles_post_ra>
